<compile_context>
chip_gen: v6e
topology: v6e:2x2x1
jax: 0.10.0
libtpu: 0.0.40
codegen_flags: <defaults>
</compile_context>

<pallas_src>
import functools

import jax
import jax.numpy as jnp
from jax import lax
from jax.experimental import pallas as pl
from jax.experimental.pallas import tpu as pltpu


def _build_row_matrices(w, W):
    """w: (3, 3, Cin, Cout) conv weights -> (3, W*Cin, W*Cout) block-Toeplitz
    matrices M_kh with width ('same', zero-pad) convolution folded in."""
    dtype = w.dtype
    # S[kw][j_in, j_out] = 1 iff j_in == j_out + kw - 1
    S = jnp.stack([jnp.eye(W, k=1, dtype=dtype),
                   jnp.eye(W, k=0, dtype=dtype),
                   jnp.eye(W, k=-1, dtype=dtype)])          # (3, W, W)
    # m[kh, j_in, cin, j_out, cout] = sum_kw S[kw, j_in, j_out] * w[kh, kw, cin, cout]
    m = jnp.einsum("kab,hkcd->hacbd", S, w)                  # (3, W, Cin, W, Cout)
    Cin, Cout = w.shape[2], w.shape[3]
    return m.reshape(3, W * Cin, W * Cout)


def _fused_conv_kernel(x_ref, m1_ref, b1_ref, m2_ref, b2_ref,
                       o1_ref, o2_ref, xp_ref, y1p_ref, *, H):
    """One image per grid step.

    x_ref : (1, H, W*Cin)        lane-dense input image
    m1_ref: (3, W*Cin,  W*Cmid)  row-conv matrices for encode
    b1_ref: (1, W*Cmid)          lane-layout bias for encode
    m2_ref: (3, W*Cmid, W*Cout)  row-conv matrices for decode
    b2_ref: (1, W*Cout)          lane-layout bias for decode
    o1_ref: (1, H, W*Cmid)       x1 output
    o2_ref: (1, H, W*Cout)       x2 output
    xp_ref : (H+2, W*Cin)  VMEM  height-padded input
    y1p_ref: (H+2, W*Cmid) VMEM  height-padded intermediate
    """
    wcin = xp_ref.shape[-1]
    wcmid = y1p_ref.shape[-1]
    wcout = o2_ref.shape[-1]

    # Height zero-padding in VMEM (scratch persists across grid steps -> re-zero halos).
    xp_ref[...] = jnp.zeros_like(xp_ref)
    xp_ref[1:H + 1, :] = x_ref[0]

    # encode: 3 row-shifted lane-dense matmuls, accumulate in f32.
    acc1 = jnp.zeros((H, wcmid), jnp.float32)
    for kh in range(3):
        acc1 = acc1 + jnp.dot(xp_ref[kh:kh + H, :], m1_ref[kh],
                              preferred_element_type=jnp.float32)
    y1 = acc1 + b1_ref[...]
    o1_ref[0] = y1.astype(o1_ref.dtype)

    # decode: same trick, consuming the VMEM-resident intermediate.
    y1p_ref[...] = jnp.zeros_like(y1p_ref)
    y1p_ref[1:H + 1, :] = y1
    acc2 = jnp.zeros((H, wcout), jnp.float32)
    for kh in range(3):
        acc2 = acc2 + jnp.dot(y1p_ref[kh:kh + H, :], m2_ref[kh],
                              preferred_element_type=jnp.float32)
    o2_ref[0] = (acc2 + b2_ref[...]).astype(o2_ref.dtype)
    del wcin  # (only used for clarity)


def get_params_forward(x_nchw, params):
    """GetParams.forward: returns (x1, x2) in NCHW, matching PyTorch."""
    w1, b1, w2, b2 = params
    N, Cin, H, W = x_nchw.shape
    Cmid = w1.shape[-1]
    Cout = w2.shape[-1]

    # NCHW -> NHWC -> lane-dense (N, H, W*Cin); NHWC row-major makes the reshape free.
    x = jnp.transpose(x_nchw, (0, 2, 3, 1)).reshape(N, H, W * Cin)

    # Weight prep (tiny, trace-time XLA ops, zero in-kernel cost).
    m1 = _build_row_matrices(w1, W)                 # (3, W*Cin,  W*Cmid)
    m2 = _build_row_matrices(w2, W)                 # (3, W*Cmid, W*Cout)
    b1l = jnp.tile(b1, W).reshape(1, W * Cmid)      # lane layout (j, c) flattened
    b2l = jnp.tile(b2, W).reshape(1, W * Cout)

    kernel = functools.partial(_fused_conv_kernel, H=H)
    o1, o2 = pl.pallas_call(
        kernel,
        out_shape=(
            jax.ShapeDtypeStruct((N, H, W * Cmid), jnp.float32),
            jax.ShapeDtypeStruct((N, H, W * Cout), jnp.float32),
        ),
        grid=(N,),
        in_specs=[
            pl.BlockSpec((1, H, W * Cin), lambda n: (n, 0, 0)),
            pl.BlockSpec((3, W * Cin, W * Cmid), lambda n: (0, 0, 0)),
            pl.BlockSpec((1, W * Cmid), lambda n: (0, 0)),
            pl.BlockSpec((3, W * Cmid, W * Cout), lambda n: (0, 0, 0)),
            pl.BlockSpec((1, W * Cout), lambda n: (0, 0)),
        ],
        out_specs=(
            pl.BlockSpec((1, H, W * Cmid), lambda n: (n, 0, 0)),
            pl.BlockSpec((1, H, W * Cout), lambda n: (n, 0, 0)),
        ),
        scratch_shapes=[
            pltpu.VMEM((H + 2, W * Cin), jnp.float32),
            pltpu.VMEM((H + 2, W * Cmid), jnp.float32),
        ],
        compiler_params=pltpu.CompilerParams(
            dimension_semantics=("parallel",)),
    )(x, m1, b1l, m2, b2l)

    # Lane-dense (N, H, W*C) -> NHWC (free reshape) -> NCHW (glue transpose).
    x1 = jnp.transpose(o1.reshape(N, H, W, Cmid), (0, 3, 1, 2))
    x2 = jnp.transpose(o2.reshape(N, H, W, Cout), (0, 3, 1, 2))
    return x1, x2


def init_params(key, c_in=4, c_mid=8):
    """Deterministic init mimicking PyTorch Conv2d default (uniform +-1/sqrt(fan_in)).
    Weights stored as (kh, kw, Cin, Cout) = HWIO."""
    k1, k2, k3, k4 = jax.random.split(key, 4)
    bound1 = 1.0 / jnp.sqrt(c_in * 9)
    bound2 = 1.0 / jnp.sqrt(c_mid * 9)
    w1 = jax.random.uniform(k1, (3, 3, c_in, c_mid), jnp.float32, -bound1, bound1)
    b1 = jax.random.uniform(k2, (c_mid,), jnp.float32, -bound1, bound1)
    w2 = jax.random.uniform(k3, (3, 3, c_mid, c_in), jnp.float32, -bound2, bound2)
    b2 = jax.random.uniform(k4, (c_in,), jnp.float32, -bound2, bound2)
    return (w1, b1, w2, b2)


def _reference_conv(x_nhwc, w, b):
    """Pure-JAX reference for correctness check (high precision)."""
    out = lax.conv_general_dilated(
        x_nhwc, w, window_strides=(1, 1), padding="SAME",
        dimension_numbers=("NHWC", "HWIO", "NHWC"),
        precision=lax.Precision.HIGHEST)
    return out + b[None, None, None, :]


if __name__ == "__main__":
    key = jax.random.PRNGKey(0)
    kx, kp = jax.random.split(key)

    N, C, H, W = 2, 4, 16, 16
    x = jax.random.normal(kx, (N, C, H, W), jnp.float32)
    params = init_params(kp, c_in=C, c_mid=8)

    x1, x2 = jax.jit(get_params_forward)(x, params)
    jax.block_until_ready((x1, x2))

    # Correctness check against pure-JAX conv reference.
    x_nhwc = jnp.transpose(x, (0, 2, 3, 1))
    r1 = _reference_conv(x_nhwc, params[0], params[1])
    r2 = _reference_conv(r1, params[2], params[3])
    r1_nchw = jnp.transpose(r1, (0, 3, 1, 2))
    r2_nchw = jnp.transpose(r2, (0, 3, 1, 2))
    assert x1.shape == (N, 8, H, W) and x2.shape == (N, C, H, W)
    assert jnp.allclose(x1, r1_nchw, atol=1e-4, rtol=1e-4)
    assert jnp.allclose(x2, r2_nchw, atol=1e-4, rtol=1e-4)

    print("KERNEL_OK")
</pallas_src>

<mosaic_0001>
module attributes {stable_mosaic.version = 11 : i64} {
  func.func @_fused_conv_kernel(%arg0: i32, %arg1: memref<1x16x64xf32, #tpu.memory_space<vmem>>, %arg2: memref<3x64x128xf32, #tpu.memory_space<vmem>>, %arg3: memref<1x128xf32, #tpu.memory_space<vmem>>, %arg4: memref<3x128x64xf32, #tpu.memory_space<vmem>>, %arg5: memref<1x64xf32, #tpu.memory_space<vmem>>, %arg6: memref<1x16x128xf32, #tpu.memory_space<vmem>>, %arg7: memref<1x16x64xf32, #tpu.memory_space<vmem>>, %arg8: memref<18x64xf32, #tpu.memory_space<vmem>>, %arg9: memref<18x128xf32, #tpu.memory_space<vmem>>) attributes {dimension_semantics = [#tpu.dimension_semantics<parallel>], iteration_bounds = array<i64: 2>, scalar_prefetch = 0 : i64, scratch_operands = 2 : i64, tpu.core_type = #tpu.core_type<tc>, window_params = [{transform_indices = @transform_0, window_bounds = array<i64: 1, 16, 64>}, {pipeline_mode = #tpu.pipeline_mode<synchronous>, transform_indices = @transform_1, window_bounds = array<i64: 3, 64, 128>}, {pipeline_mode = #tpu.pipeline_mode<synchronous>, transform_indices = @transform_2, window_bounds = array<i64: 1, 128>}, {pipeline_mode = #tpu.pipeline_mode<synchronous>, transform_indices = @transform_3, window_bounds = array<i64: 3, 128, 64>}, {pipeline_mode = #tpu.pipeline_mode<synchronous>, transform_indices = @transform_4, window_bounds = array<i64: 1, 64>}, {transform_indices = @transform_5, window_bounds = array<i64: 1, 16, 128>}, {transform_indices = @transform_6, window_bounds = array<i64: 1, 16, 64>}]} {
    %cst = arith.constant 0.000000e+00 : f32
    %0 = vector.broadcast %cst : f32 to vector<18x64xf32>
    %c0 = arith.constant 0 : index
    %c0_0 = arith.constant 0 : index
    %1 = vector.load %arg8[%c0, %c0_0] : memref<18x64xf32, #tpu.memory_space<vmem>>, vector<18x64xf32>
    tpu.vector_store %arg8[%c0, %c0_0], %0 {strides = array<i32>} : memref<18x64xf32, #tpu.memory_space<vmem>>, vector<18x64xf32>,
    %c0_1 = arith.constant 0 : index
    %c0_2 = arith.constant 0 : index
    %c0_3 = arith.constant 0 : index
    %2 = vector.load %arg1[%c0_1, %c0_2, %c0_3] : memref<1x16x64xf32, #tpu.memory_space<vmem>>, vector<1x16x64xf32>
    %3 = vector.shape_cast %2 : vector<1x16x64xf32> to vector<16x64xf32>
    %c1 = arith.constant 1 : index
    %c0_4 = arith.constant 0 : index
    %4 = vector.load %arg8[%c1, %c0_4] : memref<18x64xf32, #tpu.memory_space<vmem>>, vector<16x64xf32>
    tpu.vector_store %arg8[%c1, %c0_4], %3 {strides = array<i32>} : memref<18x64xf32, #tpu.memory_space<vmem>>, vector<16x64xf32>,
    %cst_5 = arith.constant 0.000000e+00 : f32
    %5 = vector.broadcast %cst_5 : f32 to vector<16x128xf32>
    %c0_6 = arith.constant 0 : index
    %c0_7 = arith.constant 0 : index
    %6 = vector.load %arg8[%c0_6, %c0_7] : memref<18x64xf32, #tpu.memory_space<vmem>>, vector<16x64xf32>
    %c0_8 = arith.constant 0 : index
    %c0_9 = arith.constant 0 : index
    %c0_10 = arith.constant 0 : index
    %7 = vector.load %arg2[%c0_8, %c0_9, %c0_10] : memref<3x64x128xf32, #tpu.memory_space<vmem>>, vector<1x64x128xf32>
    %8 = vector.shape_cast %7 : vector<1x64x128xf32> to vector<64x128xf32>
    %cst_11 = arith.constant dense<0.000000e+00> : vector<16x128xf32>
    %9 = tpu.matmul %6, %8, %cst_11 {dimension_numbers = #tpu.dot_dimension_numbers<[1], [0], [0], [1], [0, 0, 1, 1], [], []>} : vector<16x64xf32>, vector<64x128xf32>, vector<16x128xf32> -> vector<16x128xf32>
    %10 = arith.addf %5, %9 : vector<16x128xf32>
    %c1_12 = arith.constant 1 : index
    %c0_13 = arith.constant 0 : index
    %11 = vector.load %arg8[%c1_12, %c0_13] : memref<18x64xf32, #tpu.memory_space<vmem>>, vector<16x64xf32>
    %c1_14 = arith.constant 1 : index
    %c0_15 = arith.constant 0 : index
    %c0_16 = arith.constant 0 : index
    %12 = vector.load %arg2[%c1_14, %c0_15, %c0_16] : memref<3x64x128xf32, #tpu.memory_space<vmem>>, vector<1x64x128xf32>
    %13 = vector.shape_cast %12 : vector<1x64x128xf32> to vector<64x128xf32>
    %cst_17 = arith.constant dense<0.000000e+00> : vector<16x128xf32>
    %14 = tpu.matmul %11, %13, %cst_17 {dimension_numbers = #tpu.dot_dimension_numbers<[1], [0], [0], [1], [0, 0, 1, 1], [], []>} : vector<16x64xf32>, vector<64x128xf32>, vector<16x128xf32> -> vector<16x128xf32>
    %15 = arith.addf %10, %14 : vector<16x128xf32>
    %c2 = arith.constant 2 : index
    %c0_18 = arith.constant 0 : index
    %16 = vector.load %arg8[%c2, %c0_18] : memref<18x64xf32, #tpu.memory_space<vmem>>, vector<16x64xf32>
    %c2_19 = arith.constant 2 : index
    %c0_20 = arith.constant 0 : index
    %c0_21 = arith.constant 0 : index
    %17 = vector.load %arg2[%c2_19, %c0_20, %c0_21] : memref<3x64x128xf32, #tpu.memory_space<vmem>>, vector<1x64x128xf32>
    %18 = vector.shape_cast %17 : vector<1x64x128xf32> to vector<64x128xf32>
    %cst_22 = arith.constant dense<0.000000e+00> : vector<16x128xf32>
    %19 = tpu.matmul %16, %18, %cst_22 {dimension_numbers = #tpu.dot_dimension_numbers<[1], [0], [0], [1], [0, 0, 1, 1], [], []>} : vector<16x64xf32>, vector<64x128xf32>, vector<16x128xf32> -> vector<16x128xf32>
    %20 = arith.addf %15, %19 : vector<16x128xf32>
    %c0_23 = arith.constant 0 : index
    %c0_24 = arith.constant 0 : index
    %21 = vector.load %arg3[%c0_23, %c0_24] : memref<1x128xf32, #tpu.memory_space<vmem>>, vector<1x128xf32>
    %22 = vector.broadcast %21 : vector<1x128xf32> to vector<16x128xf32>
    %23 = arith.addf %20, %22 : vector<16x128xf32>
    %c0_25 = arith.constant 0 : index
    %c0_26 = arith.constant 0 : index
    %c0_27 = arith.constant 0 : index
    %24 = vector.load %arg6[%c0_25, %c0_26, %c0_27] : memref<1x16x128xf32, #tpu.memory_space<vmem>>, vector<1x16x128xf32>
    %25 = vector.shape_cast %24 : vector<1x16x128xf32> to vector<16x128xf32>
    %26 = vector.shape_cast %23 : vector<16x128xf32> to vector<1x16x128xf32>
    tpu.vector_store %arg6[%c0_25, %c0_26, %c0_27], %26 {strides = array<i32>} : memref<1x16x128xf32, #tpu.memory_space<vmem>>, vector<1x16x128xf32>,
    %cst_28 = arith.constant 0.000000e+00 : f32
    %27 = vector.broadcast %cst_28 : f32 to vector<18x128xf32>
    %c0_29 = arith.constant 0 : index
    %c0_30 = arith.constant 0 : index
    %28 = vector.load %arg9[%c0_29, %c0_30] : memref<18x128xf32, #tpu.memory_space<vmem>>, vector<18x128xf32>
    tpu.vector_store %arg9[%c0_29, %c0_30], %27 {strides = array<i32>} : memref<18x128xf32, #tpu.memory_space<vmem>>, vector<18x128xf32>,
    %c1_31 = arith.constant 1 : index
    %c0_32 = arith.constant 0 : index
    %29 = vector.load %arg9[%c1_31, %c0_32] : memref<18x128xf32, #tpu.memory_space<vmem>>, vector<16x128xf32>
    tpu.vector_store %arg9[%c1_31, %c0_32], %23 {strides = array<i32>} : memref<18x128xf32, #tpu.memory_space<vmem>>, vector<16x128xf32>,
    %cst_33 = arith.constant 0.000000e+00 : f32
    %30 = vector.broadcast %cst_33 : f32 to vector<16x64xf32>
    %c0_34 = arith.constant 0 : index
    %c0_35 = arith.constant 0 : index
    %31 = vector.load %arg9[%c0_34, %c0_35] : memref<18x128xf32, #tpu.memory_space<vmem>>, vector<16x128xf32>
    %c0_36 = arith.constant 0 : index
    %c0_37 = arith.constant 0 : index
    %c0_38 = arith.constant 0 : index
    %32 = vector.load %arg4[%c0_36, %c0_37, %c0_38] : memref<3x128x64xf32, #tpu.memory_space<vmem>>, vector<1x128x64xf32>
    %33 = vector.shape_cast %32 : vector<1x128x64xf32> to vector<128x64xf32>
    %cst_39 = arith.constant dense<0.000000e+00> : vector<16x64xf32>
    %34 = tpu.matmul %31, %33, %cst_39 {dimension_numbers = #tpu.dot_dimension_numbers<[1], [0], [0], [1], [0, 0, 1, 1], [], []>} : vector<16x128xf32>, vector<128x64xf32>, vector<16x64xf32> -> vector<16x64xf32>
    %35 = arith.addf %30, %34 : vector<16x64xf32>
    %c1_40 = arith.constant 1 : index
    %c0_41 = arith.constant 0 : index
    %36 = vector.load %arg9[%c1_40, %c0_41] : memref<18x128xf32, #tpu.memory_space<vmem>>, vector<16x128xf32>
    %c1_42 = arith.constant 1 : index
    %c0_43 = arith.constant 0 : index
    %c0_44 = arith.constant 0 : index
    %37 = vector.load %arg4[%c1_42, %c0_43, %c0_44] : memref<3x128x64xf32, #tpu.memory_space<vmem>>, vector<1x128x64xf32>
    %38 = vector.shape_cast %37 : vector<1x128x64xf32> to vector<128x64xf32>
    %cst_45 = arith.constant dense<0.000000e+00> : vector<16x64xf32>
    %39 = tpu.matmul %36, %38, %cst_45 {dimension_numbers = #tpu.dot_dimension_numbers<[1], [0], [0], [1], [0, 0, 1, 1], [], []>} : vector<16x128xf32>, vector<128x64xf32>, vector<16x64xf32> -> vector<16x64xf32>
    %40 = arith.addf %35, %39 : vector<16x64xf32>
    %c2_46 = arith.constant 2 : index
    %c0_47 = arith.constant 0 : index
    %41 = vector.load %arg9[%c2_46, %c0_47] : memref<18x128xf32, #tpu.memory_space<vmem>>, vector<16x128xf32>
    %c2_48 = arith.constant 2 : index
    %c0_49 = arith.constant 0 : index
    %c0_50 = arith.constant 0 : index
    %42 = vector.load %arg4[%c2_48, %c0_49, %c0_50] : memref<3x128x64xf32, #tpu.memory_space<vmem>>, vector<1x128x64xf32>
    %43 = vector.shape_cast %42 : vector<1x128x64xf32> to vector<128x64xf32>
    %cst_51 = arith.constant dense<0.000000e+00> : vector<16x64xf32>
    %44 = tpu.matmul %41, %43, %cst_51 {dimension_numbers = #tpu.dot_dimension_numbers<[1], [0], [0], [1], [0, 0, 1, 1], [], []>} : vector<16x128xf32>, vector<128x64xf32>, vector<16x64xf32> -> vector<16x64xf32>
    %45 = arith.addf %40, %44 : vector<16x64xf32>
    %c0_52 = arith.constant 0 : index
    %c0_53 = arith.constant 0 : index
    %46 = vector.load %arg5[%c0_52, %c0_53] : memref<1x64xf32, #tpu.memory_space<vmem>>, vector<1x64xf32>
    %47 = vector.broadcast %46 : vector<1x64xf32> to vector<16x64xf32>
    %48 = arith.addf %45, %47 : vector<16x64xf32>
    %c0_54 = arith.constant 0 : index
    %c0_55 = arith.constant 0 : index
    %c0_56 = arith.constant 0 : index
    %49 = vector.load %arg7[%c0_54, %c0_55, %c0_56] : memref<1x16x64xf32, #tpu.memory_space<vmem>>, vector<1x16x64xf32>
    %50 = vector.shape_cast %49 : vector<1x16x64xf32> to vector<16x64xf32>
    %51 = vector.shape_cast %48 : vector<16x64xf32> to vector<1x16x64xf32>
    tpu.vector_store %arg7[%c0_54, %c0_55, %c0_56], %51 {strides = array<i32>} : memref<1x16x64xf32, #tpu.memory_space<vmem>>, vector<1x16x64xf32>,
    return
  }
  func.func @transform_0(%arg0: i32) -> (i32, i32, i32) {
    %c0_i32 = arith.constant 0 : i32
    %c0_i32_0 = arith.constant 0 : i32
    %c0_i32_1 = arith.constant 0 : i32
    return %arg0, %c0_i32, %c0_i32_0 : i32, i32, i32
  }
  func.func @transform_1(%arg0: i32) -> (i32, i32, i32) {
    %c0_i32 = arith.constant 0 : i32
    %c0_i32_0 = arith.constant 0 : i32
    %c0_i32_1 = arith.constant 0 : i32
    %c0_i32_2 = arith.constant 0 : i32
    return %c0_i32, %c0_i32_0, %c0_i32_1 : i32, i32, i32
  }
  func.func @transform_2(%arg0: i32) -> (i32, i32) {
    %c0_i32 = arith.constant 0 : i32
    %c0_i32_0 = arith.constant 0 : i32
    %c0_i32_1 = arith.constant 0 : i32
    return %c0_i32, %c0_i32_0 : i32, i32
  }
  func.func @transform_3(%arg0: i32) -> (i32, i32, i32) {
    %c0_i32 = arith.constant 0 : i32
    %c0_i32_0 = arith.constant 0 : i32
    %c0_i32_1 = arith.constant 0 : i32
    %c0_i32_2 = arith.constant 0 : i32
    return %c0_i32, %c0_i32_0, %c0_i32_1 : i32, i32, i32
  }
  func.func @transform_4(%arg0: i32) -> (i32, i32) {
    %c0_i32 = arith.constant 0 : i32
    %c0_i32_0 = arith.constant 0 : i32
    %c0_i32_1 = arith.constant 0 : i32
    return %c0_i32, %c0_i32_0 : i32, i32
  }
  func.func @transform_5(%arg0: i32) -> (i32, i32, i32) {
    %c0_i32 = arith.constant 0 : i32
    %c0_i32_0 = arith.constant 0 : i32
    %c0_i32_1 = arith.constant 0 : i32
    return %arg0, %c0_i32, %c0_i32_0 : i32, i32, i32
  }
  func.func @transform_6(%arg0: i32) -> (i32, i32, i32) {
    %c0_i32 = arith.constant 0 : i32
    %c0_i32_0 = arith.constant 0 : i32
    %c0_i32_1 = arith.constant 0 : i32
    return %arg0, %c0_i32, %c0_i32_0 : i32, i32, i32
  }
}

</mosaic_0001>

<bundles_post_ra>
// kernel: tile.13
= control target key start
LH: loop header
LB: loop body
LE: loop exit
PB: predicated region body
PF: predicated region fallthrough
CT: control target
= control target key end

     0   :  { %s28_s0 = inlined_call_operand.vmem [shape: f32[8], index: 0, kind: input, shape index: {}]   ;;  %s29_s1 = inlined_call_operand.vmem [shape: f32[16,8], index: 1, kind: output, shape index: {}]  }
   0x1   :  { %v4_v0 = vld [vmem:[%s28_s0] ss:$0 sm:$0xff] }
   0x2   :  { %5 = vst [vmem:[%s29_s1] sm:$0xff] %v4_v0  ;;  %8 = vst [vmem:[%s29_s1 + $0x8] sm:$0xff] %v4_v0 }

// kernel: tile.14
= control target key start
LH: loop header
LB: loop body
LE: loop exit
PB: predicated region body
PF: predicated region fallthrough
CT: control target
= control target key end

     0   :  { %s133_s10 = smov 120   ;;  %s134_s11 = smov 104   ;;  %vm3_vm0 = vcmask 64512   ;;  %vm9_vm1 = vcmask 1048512   ;;  %vm15_vm2 = vcmask 982912   ;;  %vm21_vm3 = vcmask 917312   ;;  %s209_s0 = inlined_call_operand.vmem [shape: f32[16,8], index: 0, kind: input, shape index: {}]   ;;  %s210_s1 = inlined_call_operand.vmem [shape: f32[1,128], index: 1, kind: output, shape index: {}]  }
   0x1   :  { %v103_v0 = vld [vmem:[%s209_s0 + $0xf] sm:$0x1]   ;;  %v105_v1 = vld [vmem:[%s209_s0 + $0xd] sm:$0x1]   ;;  %v104_v2 = vld [vmem:[%s209_s0 + $0xe] sm:$0x1]  }
   0x2   :  { %7 = vrot.lane.b32.xlu0 %v103_v0, %s133_s10  ;;  %19 = vrot.lane.b32.xlu1 %v105_v1, %s134_s11  ;;  %v106_v3 = vld [vmem:[%s209_s0 + $0xc] sm:$0x1]   ;;  %s135_s16 = smov 112   ;;  %s136_s17 = smov 96   ;;  %v107_v4 = vld [vmem:[%s209_s0 + $0xb] sm:$0x1]  }
   0x3   :  { %v108_v5 = vld [vmem:[%s209_s0 + $0xa] sm:$0x1]   ;;  %v2_v6 = vld [vmem:[%s209_s0] sm:$0x1]   ;;  %s137_s24 = smov 88   ;;  %s138_s25 = smov 80  }
   0x4   :  { %4 = vst.msk [vmem:[#allocation0] sm:$0x1] %vm3_vm0, %v2_v6   ;;  %v109_v7 = vld [vmem:[%s209_s0 + $0x9] sm:$0x1]   ;;  %v110_v8 = vld [vmem:[%s209_s0 + $0x8] sm:$0x1]  }
   0x5   :  { %s139_s30 = smov 72   ;;  %s140_s2 = smov 64   ;;  %v111_v9 = vld [vmem:[%s209_s0 + $0x7] sm:$0x1]   ;;  %v112_v10 = vld [vmem:[%s209_s0 + $0x6] sm:$0x1]  }
   0x6   :  { %13 = vrot.lane.b32.xlu0 %v104_v2, %s135_s16  ;;  %25 = vrot.lane.b32.xlu1 %v106_v3, %s136_s17  ;;  %s141_s7 = smov 56   ;;  %s142_s8 = smov 48   ;;  %v113_v11 = vld [vmem:[%s209_s0 + $0x5] sm:$0x1]   ;;  %v114_v12 = vld [vmem:[%s209_s0 + $0x4] sm:$0x1]  }
   0x7   :  { %s143_s13 = smov 40   ;;  %s144_s14 = smov 32   ;;  %v115_v13 = vld [vmem:[%s209_s0 + $0x3] sm:$0x1]   ;;  %v116_v14 = vld [vmem:[%s209_s0 + $0x2] sm:$0x1]  }
   0x8   :  { %s145_s19 = smov 24   ;;  %s146_s20 = smov 16   ;;  %v117_v15 = vld [vmem:[%s209_s0 + $0x1] sm:$0x1]   ;;  %vm27_vm4 = vcmask 851712   ;;  %vm33_vm5 = vcmask 786112  }
   0x9   :  { %s147_s0 = smov 8   ;;  %vm39_vm6 = vcmask 720512   ;;  %vm45_vm7 = vcmask 654912   ;;  %vm51_vm8 = vcmask 589312   ;;  %vm57_vm9 = vcmask 523712  }
   0xa   :  { %31 = vrot.lane.b32.xlu0 %v107_v4, %s137_s24  ;;  %37 = vrot.lane.b32.xlu1 %v108_v5, %s138_s25  ;;  %vm63_vm10 = vcmask 458112   ;;  %vm69_vm11 = vcmask 392512   ;;  %vm75_vm12 = vcmask 326912   ;;  %vm81_vm13 = vcmask 261312  }
   0xb   :  { %vm87_vm14 = vcmask 195712   ;;  %vm93_vm15 = vcmask 130112  }
   0xe   :  { %43 = vrot.lane.b32.xlu0 %v109_v7, %s139_s30  ;;  %49 = vrot.lane.b32.xlu1 %v110_v8, %s140_s2 }
  0x12   :  { %55 = vrot.lane.b32.xlu0 %v111_v9, %s141_s7  ;;  %61 = vrot.lane.b32.xlu1 %v112_v10, %s142_s8 }
  0x16   :  { %67 = vrot.lane.b32.xlu0 %v113_v11, %s143_s13  ;;  %73 = vrot.lane.b32.xlu1 %v114_v12, %s144_s14 }
  0x1a   :  { %79 = vrot.lane.b32.xlu0 %v115_v13, %s145_s19  ;;  %85 = vrot.lane.b32.xlu1 %v116_v14, %s146_s20 }
  0x1e   :  { %91 = vrot.lane.b32.xlu0 %v117_v15, %s147_s0 }
  0x74   :  { %v8_v16 = vpop.permute.xlu0 %7   ;;  %v20_v17 = vpop.permute.xlu1 %19  }
  0x75   :  { %10 = vst.msk [vmem:[#allocation0] sm:$0x1] %vm9_vm1, %v8_v16  }
  0x78   :  { %v14_v18 = vpop.permute.xlu0 %13   ;;  %v26_v19 = vpop.permute.xlu1 %25  }
  0x79   :  { %16 = vst.msk [vmem:[#allocation0] sm:$0x1] %vm15_vm2, %v14_v18  }
  0x7a   :  { %22 = vst.msk [vmem:[#allocation0] sm:$0x1] %vm21_vm3, %v20_v17  }
  0x7b   :  { %28 = vst.msk [vmem:[#allocation0] sm:$0x1] %vm27_vm4, %v26_v19  }
  0x7c   :  { %v32_v20 = vpop.permute.xlu0 %31   ;;  %v38_v21 = vpop.permute.xlu1 %37  }
  0x7d   :  { %34 = vst.msk [vmem:[#allocation0] sm:$0x1] %vm33_vm5, %v32_v20  }
  0x7e   :  { %40 = vst.msk [vmem:[#allocation0] sm:$0x1] %vm39_vm6, %v38_v21  }
  0x80   :  { %v44_v22 = vpop.permute.xlu0 %43   ;;  %v50_v23 = vpop.permute.xlu1 %49  }
  0x81   :  { %46 = vst.msk [vmem:[#allocation0] sm:$0x1] %vm45_vm7, %v44_v22  }
  0x82   :  { %52 = vst.msk [vmem:[#allocation0] sm:$0x1] %vm51_vm8, %v50_v23  }
  0x84   :  { %v56_v24 = vpop.permute.xlu0 %55   ;;  %v62_v25 = vpop.permute.xlu1 %61  }
  0x85   :  { %58 = vst.msk [vmem:[#allocation0] sm:$0x1] %vm57_vm9, %v56_v24  }
  0x86   :  { %64 = vst.msk [vmem:[#allocation0] sm:$0x1] %vm63_vm10, %v62_v25  }
  0x88   :  { %v68_v26 = vpop.permute.xlu0 %67   ;;  %v74_v27 = vpop.permute.xlu1 %73  }
  0x89   :  { %70 = vst.msk [vmem:[#allocation0] sm:$0x1] %vm69_vm11, %v68_v26  }
  0x8a   :  { %76 = vst.msk [vmem:[#allocation0] sm:$0x1] %vm75_vm12, %v74_v27  }
  0x8c   :  { %v80_v28 = vpop.permute.xlu0 %79   ;;  %v86_v29 = vpop.permute.xlu1 %85  }
  0x8d   :  { %82 = vst.msk [vmem:[#allocation0] sm:$0x1] %vm81_vm13, %v80_v28  }
  0x8e   :  { %88 = vst.msk [vmem:[#allocation0] sm:$0x1] %vm87_vm14, %v86_v29  }
  0x90   :  { %v92_v30 = vpop.permute.xlu0 %91  }
  0x91   :  { %94 = vst.msk [vmem:[#allocation0] sm:$0x1] %vm93_vm15, %v92_v30  }
  0x98   :  { %v99_v31 = vld [vmem:[#allocation0] sm:$0x1] }
  0x99   :  { %102 = vst [vmem:[%s210_s1] sm:$0x1] %v99_v31 }

// kernel: tile.18
= control target key start
LH: loop header
LB: loop body
LE: loop exit
PB: predicated region body
PF: predicated region fallthrough
CT: control target
= control target key end

     0   :  { %s28_s0 = inlined_call_operand.vmem [shape: f32[4], index: 0, kind: input, shape index: {}]   ;;  %s29_s1 = inlined_call_operand.vmem [shape: f32[16,4], index: 1, kind: output, shape index: {}]  }
   0x1   :  { %v4_v0 = vld [vmem:[%s28_s0] ss:$0 sm:$0xff] }
   0x2   :  { %5 = vst [vmem:[%s29_s1] sm:$0xff] %v4_v0  ;;  %8 = vst [vmem:[%s29_s1 + $0x8] sm:$0xff] %v4_v0 }

// kernel: tile.19
= control target key start
LH: loop header
LB: loop body
LE: loop exit
PB: predicated region body
PF: predicated region fallthrough
CT: control target
= control target key end

     0   :  { %s133_s10 = smov 60   ;;  %s134_s11 = smov 52   ;;  %vm3_vm0 = vcmask 31744   ;;  %vm9_vm1 = vcmask 523744   ;;  %vm15_vm2 = vcmask 490944   ;;  %vm21_vm3 = vcmask 458144   ;;  %s209_s0 = inlined_call_operand.vmem [shape: f32[16,4], index: 0, kind: input, shape index: {}]   ;;  %s210_s1 = inlined_call_operand.vmem [shape: f32[1,64], index: 1, kind: output, shape index: {}]  }
   0x1   :  { %v103_v0 = vld [vmem:[%s209_s0 + $0xf] sm:$0x1]   ;;  %v105_v1 = vld [vmem:[%s209_s0 + $0xd] sm:$0x1]   ;;  %v104_v2 = vld [vmem:[%s209_s0 + $0xe] sm:$0x1]  }
   0x2   :  { %7 = vrot.lane.b32.xlu0 %v103_v0, %s133_s10  ;;  %19 = vrot.lane.b32.xlu1 %v105_v1, %s134_s11  ;;  %v106_v3 = vld [vmem:[%s209_s0 + $0xc] sm:$0x1]   ;;  %s135_s16 = smov 56   ;;  %s136_s17 = smov 48   ;;  %v107_v4 = vld [vmem:[%s209_s0 + $0xb] sm:$0x1]  }
   0x3   :  { %v108_v5 = vld [vmem:[%s209_s0 + $0xa] sm:$0x1]   ;;  %v2_v6 = vld [vmem:[%s209_s0] sm:$0x1]   ;;  %s137_s24 = smov 44   ;;  %s138_s25 = smov 40  }
   0x4   :  { %4 = vst.msk [vmem:[#allocation0] sm:$0x1] %vm3_vm0, %v2_v6   ;;  %v109_v7 = vld [vmem:[%s209_s0 + $0x9] sm:$0x1]   ;;  %v110_v8 = vld [vmem:[%s209_s0 + $0x8] sm:$0x1]  }
   0x5   :  { %s139_s30 = smov 36   ;;  %s140_s2 = smov 32   ;;  %v111_v9 = vld [vmem:[%s209_s0 + $0x7] sm:$0x1]   ;;  %v112_v10 = vld [vmem:[%s209_s0 + $0x6] sm:$0x1]  }
   0x6   :  { %13 = vrot.lane.b32.xlu0 %v104_v2, %s135_s16  ;;  %25 = vrot.lane.b32.xlu1 %v106_v3, %s136_s17  ;;  %s141_s7 = smov 28   ;;  %s142_s8 = smov 24   ;;  %v113_v11 = vld [vmem:[%s209_s0 + $0x5] sm:$0x1]   ;;  %v114_v12 = vld [vmem:[%s209_s0 + $0x4] sm:$0x1]  }
   0x7   :  { %s143_s13 = smov 20   ;;  %s144_s14 = smov 16   ;;  %v115_v13 = vld [vmem:[%s209_s0 + $0x3] sm:$0x1]   ;;  %v116_v14 = vld [vmem:[%s209_s0 + $0x2] sm:$0x1]  }
   0x8   :  { %s145_s19 = smov 12   ;;  %s146_s20 = smov 8   ;;  %v117_v15 = vld [vmem:[%s209_s0 + $0x1] sm:$0x1]   ;;  %vm27_vm4 = vcmask 425344   ;;  %vm33_vm5 = vcmask 392544  }
   0x9   :  { %s147_s0 = smov 4   ;;  %vm39_vm6 = vcmask 359744   ;;  %vm45_vm7 = vcmask 326944   ;;  %vm51_vm8 = vcmask 294144   ;;  %vm57_vm9 = vcmask 261344  }
   0xa   :  { %31 = vrot.lane.b32.xlu0 %v107_v4, %s137_s24  ;;  %37 = vrot.lane.b32.xlu1 %v108_v5, %s138_s25  ;;  %vm63_vm10 = vcmask 228544   ;;  %vm69_vm11 = vcmask 195744   ;;  %vm75_vm12 = vcmask 162944   ;;  %vm81_vm13 = vcmask 130144  }
   0xb   :  { %vm87_vm14 = vcmask 97344   ;;  %vm93_vm15 = vcmask 64544  }
   0xe   :  { %43 = vrot.lane.b32.xlu0 %v109_v7, %s139_s30  ;;  %49 = vrot.lane.b32.xlu1 %v110_v8, %s140_s2 }
  0x12   :  { %55 = vrot.lane.b32.xlu0 %v111_v9, %s141_s7  ;;  %61 = vrot.lane.b32.xlu1 %v112_v10, %s142_s8 }
  0x16   :  { %67 = vrot.lane.b32.xlu0 %v113_v11, %s143_s13  ;;  %73 = vrot.lane.b32.xlu1 %v114_v12, %s144_s14 }
  0x1a   :  { %79 = vrot.lane.b32.xlu0 %v115_v13, %s145_s19  ;;  %85 = vrot.lane.b32.xlu1 %v116_v14, %s146_s20 }
  0x1e   :  { %91 = vrot.lane.b32.xlu0 %v117_v15, %s147_s0 }
  0x74   :  { %v8_v16 = vpop.permute.xlu0 %7   ;;  %v20_v17 = vpop.permute.xlu1 %19  }
  0x75   :  { %10 = vst.msk [vmem:[#allocation0] sm:$0x1] %vm9_vm1, %v8_v16  }
  0x78   :  { %v14_v18 = vpop.permute.xlu0 %13   ;;  %v26_v19 = vpop.permute.xlu1 %25  }
  0x79   :  { %16 = vst.msk [vmem:[#allocation0] sm:$0x1] %vm15_vm2, %v14_v18  }
  0x7a   :  { %22 = vst.msk [vmem:[#allocation0] sm:$0x1] %vm21_vm3, %v20_v17  }
  0x7b   :  { %28 = vst.msk [vmem:[#allocation0] sm:$0x1] %vm27_vm4, %v26_v19  }
  0x7c   :  { %v32_v20 = vpop.permute.xlu0 %31   ;;  %v38_v21 = vpop.permute.xlu1 %37  }
  0x7d   :  { %34 = vst.msk [vmem:[#allocation0] sm:$0x1] %vm33_vm5, %v32_v20  }
  0x7e   :  { %40 = vst.msk [vmem:[#allocation0] sm:$0x1] %vm39_vm6, %v38_v21  }
  0x80   :  { %v44_v22 = vpop.permute.xlu0 %43   ;;  %v50_v23 = vpop.permute.xlu1 %49  }
  0x81   :  { %46 = vst.msk [vmem:[#allocation0] sm:$0x1] %vm45_vm7, %v44_v22  }
  0x82   :  { %52 = vst.msk [vmem:[#allocation0] sm:$0x1] %vm51_vm8, %v50_v23  }
  0x84   :  { %v56_v24 = vpop.permute.xlu0 %55   ;;  %v62_v25 = vpop.permute.xlu1 %61  }
  0x85   :  { %58 = vst.msk [vmem:[#allocation0] sm:$0x1] %vm57_vm9, %v56_v24  }
  0x86   :  { %64 = vst.msk [vmem:[#allocation0] sm:$0x1] %vm63_vm10, %v62_v25  }
  0x88   :  { %v68_v26 = vpop.permute.xlu0 %67   ;;  %v74_v27 = vpop.permute.xlu1 %73  }
  0x89   :  { %70 = vst.msk [vmem:[#allocation0] sm:$0x1] %vm69_vm11, %v68_v26  }
  0x8a   :  { %76 = vst.msk [vmem:[#allocation0] sm:$0x1] %vm75_vm12, %v74_v27  }
  0x8c   :  { %v80_v28 = vpop.permute.xlu0 %79   ;;  %v86_v29 = vpop.permute.xlu1 %85  }
  0x8d   :  { %82 = vst.msk [vmem:[#allocation0] sm:$0x1] %vm81_vm13, %v80_v28  }
  0x8e   :  { %88 = vst.msk [vmem:[#allocation0] sm:$0x1] %vm87_vm14, %v86_v29  }
  0x90   :  { %v92_v30 = vpop.permute.xlu0 %91  }
  0x91   :  { %94 = vst.msk [vmem:[#allocation0] sm:$0x1] %vm93_vm15, %v92_v30  }
  0x98   :  { %v99_v31 = vld [vmem:[#allocation0] sm:$0x1] }
  0x99   :  { %102 = vst [vmem:[%s210_s1] sm:$0x1] %v99_v31 }

// kernel: get_params_forward.1
= control target key start
LH: loop header
LB: loop body
LE: loop exit
PB: predicated region body
PF: predicated region fallthrough
CT: control target
= control target key end

     0   :  { %s1320_s21 = smov 0   ;;  %s1585_s0 = inlined_call_operand.vmem [shape: f32[2,16,64], index: 0, kind: input, shape index: {}]   ;;  %s1586_s1 = inlined_call_operand.vmem [shape: f32[3,64,128], index: 1, kind: input, shape index: {}]   ;;  %s1587_s2 = inlined_call_operand.vmem [shape: f32[1,128], index: 2, kind: input, shape index: {}]   ;;  %s1588_s3 = inlined_call_operand.vmem [shape: f32[3,128,64], index: 3, kind: input, shape index: {}]   ;;  %s1589_s4 = inlined_call_operand.vmem [shape: f32[1,64], index: 4, kind: input, shape index: {}]   ;;  %s1590_s5 = inlined_call_operand.vmem [shape: f32[2,16,128], index: 5, kind: output, shape index: {0}]   ;;  %s1591_s6 = inlined_call_operand.vmem [shape: f32[2,16,64], index: 6, kind: output, shape index: {1}]  }
   0x1 LB: > { %s949_s22 = sadd.s32 4294967295, %s1282_s21   ;;  %p953_p0 = scmp.ge.s32.totalorder %s1282_s21, 1  ;;  %s1282_s21 = sphi %s1320_s21, %s17_s21  }
   0x2   : > { %p215_p1 = scmp.lt.s32.totalorder %s1282_s21, 3 }
   0x4   : > { %p216_p2 = pnand %p953_p0, %p215_p1 }
   0x5   : > { %p1337_p3 = scmp.lt.s32.totalorder (!%p216_p2), %s949_s22, 1 }
   0x6   : > { %219 = sbr.rel (%p216_p2) target bundleno = 479 (0x1df), region = 40 }
   0xb   : > { %v967_v0 = vld [vmem:[%s1586_s1 + $0x78] sm:$0xff]  ;;  %v966_v2 = vld [vmem:[%s1586_s1 + $0x70] sm:$0xff]  ;;  %vm265_vm0 = vcmask 523264   ;;  %v1284_v4 = vmov 0.0   ;;  %vm268_vm1 = vcmask 517120   ;;  %v965_v5 = vld [vmem:[%s1586_s1 + $0x68] sm:$0xff] }
   0xc   : > { %v283_v1 = vld [vmem:[%s1586_s1 + $0x38] sm:$0xff]  ;;  %1105 = vmatprep.subr.mxu0 %v967_v0  ;;  %v282_v3 = vld [vmem:[%s1586_s1 + $0x30] sm:$0xff]  ;;  %266 = vst.msk [vmem:[#allocation2] sm:$0xff] %vm265_vm0, %v1284_v4  ;;  %267 = vst.msk [vmem:[#allocation2 + $0x8] sm:$0xff] %vm265_vm0, %v1284_v4  ;;  %s1594_s22 = smov (!%p1337_p3, %s949_s22), 1 }
   0xd   : > { %1124 = vmatprep.subr.mxu1 %v283_v1  ;;  %562 = vst [vmem:[#allocation3] sm:$0xff] %v1284_v4  ;;  %563 = vst [vmem:[#allocation3 + $0x8] sm:$0xff] %v1284_v4  ;;  %1106 = vmatpush3.msra.mxu0 %v967_v0  ;;  %v281_v6 = vld [vmem:[%s1586_s1 + $0x28] sm:$0xff]  ;;  %v964_v7 = vld [vmem:[%s1586_s1 + $0x60] sm:$0xff]  ;;  %s1360_s16 = sshll.u32 %s1594_s22, 4 }
   0xe   : > { %564 = vst [vmem:[#allocation3 + $0x10] sm:$0x3] %v1284_v4  ;;  %1125 = vmatpush3.msra.mxu1 %v283_v1  ;;  %269 = vst.msk [vmem:[#allocation2 + $0x10] sm:$0x3] %vm268_vm1, %v1284_v4  ;;  %1107 = vmatprep.subr.mxu0 %v966_v2  ;;  %v280_v8 = vld [vmem:[%s1586_s1 + $0x20] sm:$0xff]  ;;  %v963_v9 = vld [vmem:[%s1586_s1 + $0x58] sm:$0xff]  ;;  %s254_s23 = scalar_lea.vmem %s1585_s0, %s1360_s16  ;;  %s259_s11 = scalar_lea.vmem %s1590_s5, %s1360_s16 }
   0xf   : > { %1126 = vmatprep.subr.mxu1 %v282_v3  ;;  %1108 = vmatpush3.msra.mxu0 %v966_v2  ;;  %v279_v10 = vld [vmem:[%s1586_s1 + $0x18] sm:$0xff]  ;;  %v270_v11 = vld [vmem:[%s254_s23] sm:$0xff]  ;;  %v271_v12 = vld [vmem:[%s254_s23 + $0x8] sm:$0xff]  ;;  %s264_s26 = scalar_lea.vmem %s1591_s6, %s1360_s16 }
  0x10   : > { %1127 = vmatpush3.msra.mxu1 %v282_v3  ;;  %1109 = vmatprep.subr.mxu0 %v965_v5  ;;  %272 = vst.msk [vmem:[#allocation2 + $0x1] sm:$0xff] %vm265_vm0, %v270_v11  ;;  %273 = vst.msk [vmem:[#allocation2 + $0x9] sm:$0xff] %vm265_vm0, %v271_v12  ;;  %v962_v13 = vld [vmem:[%s1586_s1 + $0x50] sm:$0xff]  ;;  %v961_v15 = vld [vmem:[%s1586_s1 + $0x48] sm:$0xff] }
  0x11   : > { %1128 = vmatprep.subr.mxu1 %v281_v6  ;;  %1110 = vmatpush3.msra.mxu0 %v965_v5  ;;  %v278_v14 = vld [vmem:[%s1586_s1 + $0x10] sm:$0xff]  ;;  %v277_v16 = vld [vmem:[%s1586_s1 + $0x8] sm:$0xff]  ;;  %v960_v17 = vld [vmem:[%s1586_s1 + $0x40] sm:$0xff] }
  0x12   : > { %1129 = vmatpush3.msra.mxu1 %v281_v6  ;;  %1111 = vmatprep.subr.mxu0 %v964_v7  ;;  %v276_v18 = vld [vmem:[%s1586_s1] sm:$0xff]  ;;  %v979_v23 = vld [vmem:[%s1586_s1 + $0xb8] sm:$0xff]  ;;  %v978_v26 = vld [vmem:[%s1586_s1 + $0xb0] sm:$0xff] }
  0x13   : > { %1130 = vmatprep.subr.mxu1 %v280_v8  ;;  %1112 = vmatpush3.msra.mxu0 %v964_v7  ;;  %v998_v25 = vld [vmem:[%s1588_s3 + $0xf8] sm:$0xff]  ;;  %v977_v27 = vld [vmem:[%s1586_s1 + $0xa8] sm:$0xff]  ;;  %v976_v28 = vld [vmem:[%s1586_s1 + $0xa0] sm:$0xff] }
  0x14   : > { %1131 = vmatpush3.msra.mxu1 %v280_v8  ;;  %1113 = vmatprep.subr.mxu0 %v963_v9  ;;  %v975_v29 = vld [vmem:[%s1586_s1 + $0x98] sm:$0xff]  ;;  %v974_v30 = vld [vmem:[%s1586_s1 + $0x90] sm:$0xff]  ;;  %v973_v31 = vld [vmem:[%s1586_s1 + $0x88] sm:$0xff] }
  0x15   : > { %1132 = vmatprep.subr.mxu1 %v279_v10  ;;  %1114 = vmatpush3.msra.mxu0 %v963_v9  ;;  %v972_v32 = vld [vmem:[%s1586_s1 + $0x80] sm:$0xff]  ;;  %v997_v34 = vld [vmem:[%s1588_s3 + $0xf0] sm:$0xff]  ;;  %v996_v35 = vld [vmem:[%s1588_s3 + $0xe8] sm:$0xff] }
  0x16   : > { %1133 = vmatpush3.msra.mxu1 %v279_v10  ;;  %1115 = vmatprep.subr.mxu0 %v962_v13  ;;  %v995_v36 = vld [vmem:[%s1588_s3 + $0xe0] sm:$0xff]  ;;  %v994_v37 = vld [vmem:[%s1588_s3 + $0xd8] sm:$0xff]  ;;  %v993_v39 = vld [vmem:[%s1588_s3 + $0xd0] sm:$0xff] }
  0x17   : > { %1134 = vmatprep.subr.mxu1 %v278_v14  ;;  %1116 = vmatpush3.msra.mxu0 %v962_v13  ;;  %v284_v19 = vld [vmem:[#allocation2 + $0x1] sm:$0xff]  ;;  %v285_v21 = vld [vmem:[#allocation2 + $0x9] sm:$0xff]  ;;  %v584_v38 = vld [vmem:[%s1588_s3 + $0x78] sm:$0xff] }
  0x18   : > { %1135 = vmatpush3.msra.mxu1 %v278_v14  ;;  %1117 = vmatprep.subr.mxu0 %v961_v15  ;;  %v274_v20 = vld [vmem:[#allocation2] sm:$0xff]  ;;  %v275_v22 = vld [vmem:[#allocation2 + $0x8] sm:$0xff]  ;;  %v583_v40 = vld [vmem:[%s1588_s3 + $0x70] sm:$0xff] }
  0x19   : > { %1136 = vmatprep.subr.mxu1 %v277_v16  ;;  %1118 = vmatpush3.msra.mxu0 %v961_v15  ;;  %v457_v24 = vld [vmem:[#allocation2 + $0x2] sm:$0xff]  ;;  %v458_v33 = vld [vmem:[#allocation2 + $0xa] sm:$0xff]  ;;  %v580_v45 = vld [vmem:[%s1588_s3 + $0x58] sm:$0xff] }
  0x1a   : > { %1137 = vmatpush3.msra.mxu1 %v277_v16  ;;  %1119 = vmatprep.subr.mxu0 %v960_v17  ;;  %v582_v41 = vld [vmem:[%s1588_s3 + $0x68] sm:$0xff]  ;;  %v581_v42 = vld [vmem:[%s1588_s3 + $0x60] sm:$0xff]  ;;  %v990_v46 = vld [vmem:[%s1588_s3 + $0xb8] sm:$0xff] }
  0x1b   : > { %1138 = vmatprep.subr.mxu1 %v276_v18  ;;  %1120 = vmatpush3.msra.mxu0 %v960_v17  ;;  %v992_v43 = vld [vmem:[%s1588_s3 + $0xc8] sm:$0xff]  ;;  %v991_v44 = vld [vmem:[%s1588_s3 + $0xc0] sm:$0xff]  ;;  %v579_v47 = vld [vmem:[%s1588_s3 + $0x50] sm:$0xff] }
  0x1c   : > { %1121 = vmatprep.mubr.msk.f32.mxu0 %vm265_vm0, %v284_v19  ;;  %1139 = vmatpush3.msra.mxu1 %v276_v18  ;;  %v989_v48 = vld [vmem:[%s1588_s3 + $0xb0] sm:$0xff]  ;;  %v578_v49 = vld [vmem:[%s1588_s3 + $0x48] sm:$0xff]  ;;  %v577_v51 = vld [vmem:[%s1588_s3 + $0x40] sm:$0xff] }
  0x1d   : > { %1140 = vmatprep.mubr.msk.f32.mxu1 %vm265_vm0, %v274_v20  ;;  %1122 = vmatmul.mubr.msk.f32.vlgmr.msra.gmra.mxu0 %vm265_vm0, %v285_v21  ;;  %v988_v50 = vld [vmem:[%s1588_s3 + $0xa8] sm:$0xff]  ;;  %v987_v52 = vld [vmem:[%s1588_s3 + $0xa0] sm:$0xff]  ;;  %v986_v53 = vld [vmem:[%s1588_s3 + $0x98] sm:$0xff] }
  0x1e   : > { %1141 = vmatmul.mubr.msk.f32.vlgmr.msra.gmra.mxu1 %vm265_vm0, %v275_v22  ;;  %1143 = vmatprep.subr.mxu0 %v979_v23  ;;  %v576_v54 = vld [vmem:[%s1588_s3 + $0x38] sm:$0xff]  ;;  %v985_v55 = vld [vmem:[%s1588_s3 + $0x90] sm:$0xff]  ;;  %v984_v57 = vld [vmem:[%s1588_s3 + $0x88] sm:$0xff] }
  0x1f   : > { %1159 = vmatprep.mubr.msk.f32.mxu0 %vm265_vm0, %v457_v24  ;;  %1144 = vmatpush3.msra.mxu0 %v979_v23  ;;  %v575_v56 = vld [vmem:[%s1588_s3 + $0x30] sm:$0xff]  ;;  %v574_v58 = vld [vmem:[%s1588_s3 + $0x28] sm:$0xff]  ;;  %v983_v59 = vld [vmem:[%s1588_s3 + $0x80] sm:$0xff] }
  0x20   : > { %1162 = vmatprep.subr.mxu1 %v998_v25  ;;  %1145 = vmatprep.subr.mxu0 %v978_v26  ;;  %v573_v60 = vld [vmem:[%s1588_s3 + $0x20] sm:$0xff]  ;;  %v1014_v61 = vld [vmem:[%s1588_s3 + $0x178] sm:$0xff]  ;;  %v571_v63 = vld [vmem:[%s1588_s3 + $0x10] sm:$0xff] }
  0x21   : > { %1163 = vmatpush3.msra.mxu1 %v998_v25  ;;  %1146 = vmatpush3.msra.mxu0 %v978_v26  ;;  %v572_v62 = vld [vmem:[%s1588_s3 + $0x18] sm:$0xff]  ;;  %v570_v0 = vld [vmem:[%s1588_s3 + $0x8] sm:$0xff]  ;;  %v569_v1 = vld [vmem:[%s1588_s3] sm:$0xff] }
  0x22   : > { %1147 = vmatprep.subr.mxu0 %v977_v27  ;;  %1164 = vmatprep.subr.mxu1 %v997_v34  ;;  %v982_v8 = vld [vmem:[%s1587_s2] ss:$0 sm:$0xff]  ;;  %v1013_v15 = vld [vmem:[%s1588_s3 + $0x170] sm:$0xff]  ;;  %v1012_v16 = vld [vmem:[%s1588_s3 + $0x168] sm:$0xff] }
  0x23   : > { %1148 = vmatpush3.msra.mxu0 %v977_v27  ;;  %1165 = vmatpush3.msra.mxu1 %v997_v34  ;;  %v1011_v17 = vld [vmem:[%s1588_s3 + $0x160] sm:$0xff]  ;;  %v1010_v18 = vld [vmem:[%s1588_s3 + $0x158] sm:$0xff]  ;;  %v1009_v22 = vld [vmem:[%s1588_s3 + $0x150] sm:$0xff] }
  0x24   : > { %1149 = vmatprep.subr.mxu0 %v976_v28  ;;  %1166 = vmatprep.subr.mxu1 %v996_v35  ;;  %v1008_v23 = vld [vmem:[%s1588_s3 + $0x148] sm:$0xff]  ;;  %v1007_v24 = vld [vmem:[%s1588_s3 + $0x140] sm:$0xff]  ;;  %v1006_v25 = vld [vmem:[%s1588_s3 + $0x138] sm:$0xff] }
  0x25   : > { %1150 = vmatpush3.msra.mxu0 %v976_v28  ;;  %1167 = vmatpush3.msra.mxu1 %v996_v35  ;;  %v1005_v26 = vld [vmem:[%s1588_s3 + $0x130] sm:$0xff]  ;;  %v1004_v27 = vld [vmem:[%s1588_s3 + $0x128] sm:$0xff]  ;;  %v1003_v28 = vld [vmem:[%s1588_s3 + $0x120] sm:$0xff] }
  0x26   : > { %1151 = vmatprep.subr.mxu0 %v975_v29  ;;  %1168 = vmatprep.subr.mxu1 %v995_v36 }
  0x27   : > { %1152 = vmatpush3.msra.mxu0 %v975_v29  ;;  %1169 = vmatpush3.msra.mxu1 %v995_v36  ;;  %v1002_v29 = vld [vmem:[%s1588_s3 + $0x118] sm:$0xff] }
  0x28   : > { %1153 = vmatprep.subr.mxu0 %v974_v30  ;;  %1170 = vmatprep.subr.mxu1 %v994_v37 }
  0x29   : > { %1154 = vmatpush3.msra.mxu0 %v974_v30  ;;  %1171 = vmatpush3.msra.mxu1 %v994_v37  ;;  %v1001_v30 = vld [vmem:[%s1588_s3 + $0x110] sm:$0xff] }
  0x2a   : > { %1155 = vmatprep.subr.mxu0 %v973_v31  ;;  %1172 = vmatprep.subr.mxu1 %v993_v39 }
  0x2b   : > { %1156 = vmatpush3.msra.mxu0 %v973_v31  ;;  %1173 = vmatpush3.msra.mxu1 %v993_v39  ;;  %v1000_v31 = vld [vmem:[%s1588_s3 + $0x108] sm:$0xff] }
  0x2c   : > { %1157 = vmatprep.subr.mxu0 %v972_v32  ;;  %1174 = vmatprep.subr.mxu1 %v992_v43 }
  0x2d   : > { %1158 = vmatpush3.msra.mxu0 %v972_v32  ;;  %1175 = vmatpush3.msra.mxu1 %v992_v43  ;;  %v999_v32 = vld [vmem:[%s1588_s3 + $0x100] sm:$0xff] }
  0x2e   : > { %1160 = vmatmul.mubr.msk.f32.vlgmr.msra.gmra.mxu0 %vm265_vm0, %v458_v33  ;;  %1197 = vmatprep.subr.mxu0 %v584_v38 }
  0x2f   : > { %1198 = vmatpush3.msra.mxu0 %v584_v38  ;;  %1176 = vmatprep.subr.mxu1 %v991_v44 }
  0x30   : > { %1199 = vmatprep.subr.mxu0 %v583_v40  ;;  %1177 = vmatpush3.msra.mxu1 %v991_v44 }
  0x31   : > { %1200 = vmatpush3.msra.mxu0 %v583_v40  ;;  %1178 = vmatprep.subr.mxu1 %v990_v46  ;;  %v1015_v40 = vld [vmem:[%s1589_s4] ss:$0 sm:$0xff] }
  0x32   : > { %1201 = vmatprep.subr.mxu0 %v582_v41  ;;  %1179 = vmatpush3.msra.mxu1 %v990_v46 }
  0x33   : > { %1202 = vmatpush3.msra.mxu0 %v582_v41  ;;  %1180 = vmatprep.subr.mxu1 %v989_v48 }
  0x34   : > { %1203 = vmatprep.subr.mxu0 %v581_v42  ;;  %1181 = vmatpush3.msra.mxu1 %v989_v48 }
  0x35   : > { %1204 = vmatpush3.msra.mxu0 %v581_v42  ;;  %1182 = vmatprep.subr.mxu1 %v988_v50 }
  0x36   : > { %1205 = vmatprep.subr.mxu0 %v580_v45  ;;  %1183 = vmatpush3.msra.mxu1 %v988_v50 }
  0x37   : > { %1206 = vmatpush3.msra.mxu0 %v580_v45  ;;  %1184 = vmatprep.subr.mxu1 %v987_v52 }
  0x38   : > { %1207 = vmatprep.subr.mxu0 %v579_v47  ;;  %1185 = vmatpush3.msra.mxu1 %v987_v52 }
  0x39   : > { %1208 = vmatpush3.msra.mxu0 %v579_v47  ;;  %1186 = vmatprep.subr.mxu1 %v986_v53 }
  0x3a   : > { %1209 = vmatprep.subr.mxu0 %v578_v49  ;;  %1187 = vmatpush3.msra.mxu1 %v986_v53 }
  0x3b   : > { %1210 = vmatpush3.msra.mxu0 %v578_v49  ;;  %1188 = vmatprep.subr.mxu1 %v985_v55 }
  0x3c   : > { %1211 = vmatprep.subr.mxu0 %v577_v51  ;;  %1189 = vmatpush3.msra.mxu1 %v985_v55 }
  0x3d   : > { %1212 = vmatpush3.msra.mxu0 %v577_v51  ;;  %1190 = vmatprep.subr.mxu1 %v984_v57 }
  0x3e   : > { %1213 = vmatprep.subr.mxu0 %v576_v54  ;;  %1191 = vmatpush3.msra.mxu1 %v984_v57 }
  0x3f   : > { %1214 = vmatpush3.msra.mxu0 %v576_v54  ;;  %1192 = vmatprep.subr.mxu1 %v983_v59 }
  0x40   : > { %1215 = vmatprep.subr.mxu0 %v575_v56  ;;  %1193 = vmatpush3.msra.mxu1 %v983_v59 }
  0x41   : > { %1216 = vmatpush3.msra.mxu0 %v575_v56  ;;  %1232 = vmatprep.subr.mxu1 %v1014_v61 }
  0x42   : > { %1217 = vmatprep.subr.mxu0 %v574_v58 }
  0x43   : > { %1218 = vmatpush3.msra.mxu0 %v574_v58 }
  0x44   : > { %1219 = vmatprep.subr.mxu0 %v573_v60 }
  0x45   : > { %1220 = vmatpush3.msra.mxu0 %v573_v60 }
  0x46   : > { %1221 = vmatprep.subr.mxu0 %v572_v62 }
  0x47   : > { %1222 = vmatpush3.msra.mxu0 %v572_v62 }
  0x48   : > { %1223 = vmatprep.subr.mxu0 %v571_v63 }
  0x49   : > { %1224 = vmatpush3.msra.mxu0 %v571_v63 }
  0x4a   : > { %1225 = vmatprep.subr.mxu0 %v570_v0 }
  0x4b   : > { %1226 = vmatpush3.msra.mxu0 %v570_v0 }
  0x4c   : > { %1227 = vmatprep.subr.mxu0 %v569_v1 }
  0x4d   : > { %1228 = vmatpush3.msra.mxu0 %v569_v1 }
  0xdd   : > { %v1123_v2 = vpop.f32.mrf.mxu0 }
  0xde   : > { %v1142_v3 = vpop.f32.mrf.mxu1 }
  0xdf   : > { %v367_v4 = vpop.f32.mrf.mxu0  ;;  %v454_v6 = vadd.f32 %v1142_v3, %v1123_v2 }
  0xe0   : > { %v448_v5 = vpop.f32.mrf.mxu1 }
  0xe1   : > { %v449_v9 = vadd.f32 %v448_v5, %v367_v4 }
  0xee   : > { %v1161_v7 = vpop.f32.mrf.mxu0 }
  0xef   : > { %v550_v10 = vadd.f32 %v1161_v7, %v454_v6 }
  0xf0   : > { %v540_v11 = vpop.f32.mrf.mxu0 }
  0xf1   : > { %v559_v12 = vadd.f32 %v982_v8, %v550_v10  ;;  %v549_v13 = vadd.f32 %v540_v11, %v449_v9 }
  0xf3   : > { %561 = vst [vmem:[%s259_s11 + $0x8] sm:$0xff] %v559_v12  ;;  %566 = vst [vmem:[#allocation3 + $0x9] sm:$0xff] %v559_v12  ;;  %v558_v14 = vadd.f32 %v982_v8, %v549_v13 }
  0xf5   : > { %560 = vst [vmem:[%s259_s11] sm:$0xff] %v558_v14  ;;  %565 = vst [vmem:[#allocation3 + $0x1] sm:$0xff] %v558_v14  ;;  %1194 = vmatprep.mubr.f32.mxu1 %v558_v14 }
  0xf6   : > { %1195 = vmatmul.mubr.f32.vlgmr.msra.gmra.mxu1 %v559_v12 }
  0xf7   : > { %1233 = vmatpush3.msra.mxu1 %v1014_v61 }
  0xf8   : > { %1234 = vmatprep.subr.mxu1 %v1013_v15 }
  0xf9   : > { %1235 = vmatpush3.msra.mxu1 %v1013_v15 }
  0xfa   : > { %1236 = vmatprep.subr.mxu1 %v1012_v16  ;;  %v755_v33 = vld [vmem:[#allocation3 + $0xa] sm:$0xff] }
  0xfb   : > { %1237 = vmatpush3.msra.mxu1 %v1012_v16 }
  0xfc   : > { %v567_v19 = vld [vmem:[#allocation3] sm:$0xff]  ;;  %v568_v20 = vld [vmem:[#allocation3 + $0x8] sm:$0xff]  ;;  %1238 = vmatprep.subr.mxu1 %v1011_v17 }
  0xfd   : > { %v754_v21 = vld [vmem:[#allocation3 + $0x2] sm:$0xff]  ;;  %1229 = vmatprep.mubr.f32.mxu0 %v567_v19  ;;  %1239 = vmatpush3.msra.mxu1 %v1011_v17 }
  0xfe   : > { %1264 = vmatprep.mubr.f32.mxu1 %v754_v21  ;;  %1230 = vmatmul.mubr.f32.vlgmr.msra.gmra.mxu0 %v568_v20 }
  0xff   : > { %1240 = vmatprep.subr.mxu1 %v1010_v18 }
 0x100   : > { %1241 = vmatpush3.msra.mxu1 %v1010_v18 }
 0x101   : > { %1242 = vmatprep.subr.mxu1 %v1009_v22 }
 0x102   : > { %1243 = vmatpush3.msra.mxu1 %v1009_v22 }
 0x103   : > { %1244 = vmatprep.subr.mxu1 %v1008_v23 }
 0x104   : > { %1245 = vmatpush3.msra.mxu1 %v1008_v23 }
 0x105   : > { %1246 = vmatprep.subr.mxu1 %v1007_v24 }
 0x106   : > { %1247 = vmatpush3.msra.mxu1 %v1007_v24 }
 0x107   : > { %1248 = vmatprep.subr.mxu1 %v1006_v25 }
 0x108   : > { %1249 = vmatpush3.msra.mxu1 %v1006_v25 }
 0x109   : > { %1250 = vmatprep.subr.mxu1 %v1005_v26 }
 0x10a   : > { %1251 = vmatpush3.msra.mxu1 %v1005_v26 }
 0x10b   : > { %1252 = vmatprep.subr.mxu1 %v1004_v27 }
 0x10c   : > { %1253 = vmatpush3.msra.mxu1 %v1004_v27 }
 0x10d   : > { %1254 = vmatprep.subr.mxu1 %v1003_v28 }
 0x10e   : > { %1255 = vmatpush3.msra.mxu1 %v1003_v28 }
 0x10f   : > { %1256 = vmatprep.subr.mxu1 %v1002_v29 }
 0x110   : > { %1257 = vmatpush3.msra.mxu1 %v1002_v29 }
 0x111   : > { %1258 = vmatprep.subr.mxu1 %v1001_v30 }
 0x112   : > { %1259 = vmatpush3.msra.mxu1 %v1001_v30 }
 0x113   : > { %1260 = vmatprep.subr.mxu1 %v1000_v31 }
 0x114   : > { %1261 = vmatpush3.msra.mxu1 %v1000_v31 }
 0x115   : > { %1262 = vmatprep.subr.mxu1 %v999_v32 }
 0x116   : > { %1263 = vmatpush3.msra.mxu1 %v999_v32 }
 0x117   : > { %1265 = vmatmul.mubr.f32.vlgmr.msra.gmra.mxu1 %v755_v33 }
 0x1b6   : > { %v1196_v34 = vpop.f32.mrf.mxu1 }
 0x1b8   : > { %v670_v36 = vpop.f32.mrf.mxu1 }
 0x1be   : > { %v1231_v35 = vpop.f32.mrf.mxu0 }
 0x1bf   : > { %v751_v38 = vadd.f32 %v1231_v35, %v1196_v34 }
 0x1c0   : > { %v745_v37 = vpop.f32.mrf.mxu0 }
 0x1c1   : > { %v746_v41 = vadd.f32 %v745_v37, %v670_v36 }
 0x1d7   : > { %v1266_v39 = vpop.f32.mrf.mxu1 }
 0x1d8   : > { %v849_v42 = vadd.f32 %v1266_v39, %v751_v38 }
 0x1d9   : > { %v839_v43 = vpop.f32.mrf.mxu1 }
 0x1da   : > { %v858_v44 = vadd.f32 %v1015_v40, %v849_v42  ;;  %v848_v45 = vadd.f32 %v839_v43, %v746_v41 }
 0x1dc   : > { %860 = vst.msk [vmem:[%s264_s26 + $0x8] sm:$0xff] %vm265_vm0, %v858_v44  ;;  %v857_v46 = vadd.f32 %v1015_v40, %v848_v45 }
 0x1de   : > { %859 = vst.msk [vmem:[%s264_s26] sm:$0xff] %vm265_vm0, %v857_v46 }
 0x1df PF: > { %s17_s21 = sadd.s32 1, %s1282_s21  }
 0x1e0   : > { %p14_p4 = scmp.ge.s32.totalorder %s17_s21, 4  }
 0x1e2   :  { %16 = sbr.rel (!%p14_p4) target bundleno = 1 (0x1), region = 86 }

</bundles_post_ra>
